<compile_context>
chip_gen: v6e
topology: v6e:2x2x1
jax: 0.10.0
libtpu: 0.0.40
codegen_flags: <defaults>
</compile_context>

<pallas_src>
import functools

import jax
import jax.numpy as jnp
import numpy as np
from jax.experimental import pallas as pl
from jax.experimental.pallas import tpu as pltpu


def _linear_plus_lora_kernel(x_ref, w_ref, b_ref, a_ref, bmat_ref, o_ref,
                             acc_ref, xa_ref, *, alpha):
    k = pl.program_id(2)
    nk = pl.num_programs(2)

    @pl.when(k == 0)
    def _():
        acc_ref[...] = jnp.zeros_like(acc_ref)
        xa_ref[...] = jnp.zeros_like(xa_ref)

    x = x_ref[...]                                       # (tm, tk)

    # Base linear: x @ W^T via dot_general contracting K on both operands
    # (W stays in its native [out, K] layout; no transpose on the tile).
    acc_ref[...] += jax.lax.dot_general(
        x, w_ref[...],
        dimension_numbers=(((1,), (1,)), ((), ())),
        preferred_element_type=jnp.float32)              # (tm, tn)

    # LoRA first stage: accumulate x @ A in f32 (shares the K reduction).
    xa_ref[...] += jnp.dot(x, a_ref[...],
                           preferred_element_type=jnp.float32)  # (tm, r)

    @pl.when(k == nk - 1)
    def _():
        # Fold alpha into the small (tm, rank) intermediate, keep it in f32.
        xa = alpha * xa_ref[...]
        lora = jnp.dot(xa, bmat_ref[...].astype(jnp.float32),
                       preferred_element_type=jnp.float32)      # (tm, tn)
        out = acc_ref[...] + b_ref[...].astype(jnp.float32) + lora
        o_ref[...] = out.astype(o_ref.dtype)


def linear_plus_lora(x, w, b, A, B, alpha, *, tm=256, tn=256, tk=512):
    """x: (M, K); w: (out, K); b: (out,); A: (K, r); B: (r, out)."""
    M, K = x.shape
    N = w.shape[0]
    r = A.shape[1]

    # Clamp tiles to the actual dims (demo shapes use the full extent; real
    # deployments should keep out_features / K multiples of 128 and tm a
    # multiple of the sublane packing: 8 for f32, 16 for bf16).
    tm = min(tm, M)
    tn = min(tn, N)
    tk = min(tk, K)

    b2d = b.reshape(1, N)
    grid = (pl.cdiv(M, tm), pl.cdiv(N, tn), pl.cdiv(K, tk))
    kernel = functools.partial(_linear_plus_lora_kernel, alpha=float(alpha))

    flops = 2 * M * N * K + 2 * M * K * r + 2 * M * r * N
    bytes_accessed = (x.size * x.dtype.itemsize
                      + w.size * w.dtype.itemsize
                      + b.size * b.dtype.itemsize
                      + A.size * A.dtype.itemsize
                      + B.size * B.dtype.itemsize
                      + M * N * x.dtype.itemsize)

    return pl.pallas_call(
        kernel,
        out_shape=jax.ShapeDtypeStruct((M, N), x.dtype),
        grid_spec=pltpu.PrefetchScalarGridSpec(
            num_scalar_prefetch=0,
            grid=grid,
            in_specs=[
                pl.BlockSpec((tm, tk), lambda i, j, k: (i, k)),   # x tile
                pl.BlockSpec((tn, tk), lambda i, j, k: (j, k)),   # W tile
                pl.BlockSpec((1, tn), lambda i, j, k: (0, j)),    # bias tile
                pl.BlockSpec((tk, r), lambda i, j, k: (k, 0)),    # A tile
                pl.BlockSpec((r, tn), lambda i, j, k: (0, j)),    # B tile
            ],
            out_specs=pl.BlockSpec((tm, tn), lambda i, j, k: (i, j)),
            scratch_shapes=[
                pltpu.VMEM((tm, tn), jnp.float32),   # base/out accumulator
                pltpu.VMEM((tm, r), jnp.float32),    # x @ A accumulator
            ],
        ),
        compiler_params=pltpu.CompilerParams(
            dimension_semantics=("parallel", "parallel", "arbitrary")),
        cost_estimate=pl.CostEstimate(flops=flops, transcendentals=0,
                                      bytes_accessed=bytes_accessed),
    )(x, w, b2d, A, B)


if __name__ == "__main__":
    # Small shapes consistent with the module: batch=2, seq=8 tokens,
    # in_features=32, out_features=32, LoRA rank=8, alpha=4.0
    batch, seq = 2, 8
    in_features, out_features = 32, 32
    rank, alpha = 8, 4.0

    key = jax.random.PRNGKey(0)
    kx, kw, kb, ka = jax.random.split(key, 4)

    x = jax.random.normal(kx, (batch, seq, in_features), dtype=jnp.float32)

    # nn.Linear parameters (deterministic synthetic init)
    w = jax.random.normal(kw, (out_features, in_features), dtype=jnp.float32) * 0.1
    b = jax.random.normal(kb, (out_features,), dtype=jnp.float32) * 0.1

    # LoraLayer init: A = randn(in, rank) / sqrt(rank), B = zeros(rank, out).
    # Use a non-zero B here so the LoRA path is actually exercised numerically.
    A = jax.random.normal(ka, (in_features, rank), dtype=jnp.float32) / jnp.sqrt(
        jnp.float32(rank))
    B = jax.random.normal(jax.random.PRNGKey(1), (rank, out_features),
                          dtype=jnp.float32) * 0.05

    # Flatten leading dims (matches torch's x @ W behaviour on the last axis)
    x2d = x.reshape(batch * seq, in_features)

    out2d = linear_plus_lora(x2d, w, b, A, B, alpha)
    out = out2d.reshape(batch, seq, out_features)
    jax.block_until_ready(out)

    # Reference check in plain JAX
    ref = x @ w.T + b + alpha * (x @ A @ B)
    np.testing.assert_allclose(np.asarray(out), np.asarray(ref), rtol=1e-5, atol=1e-5)

    print("KERNEL_OK")
</pallas_src>

<mosaic_0001>
module attributes {stable_mosaic.version = 11 : i64} {
  func.func @_linear_plus_lora_kernel(%arg0: i32, %arg1: i32, %arg2: i32, %arg3: memref<16x32xf32, #tpu.memory_space<vmem>>, %arg4: memref<32x32xf32, #tpu.memory_space<vmem>>, %arg5: memref<1x32xf32, #tpu.memory_space<vmem>>, %arg6: memref<32x8xf32, #tpu.memory_space<vmem>>, %arg7: memref<8x32xf32, #tpu.memory_space<vmem>>, %arg8: memref<16x32xf32, #tpu.memory_space<vmem>>, %arg9: memref<16x32xf32, #tpu.memory_space<vmem>>, %arg10: memref<16x8xf32, #tpu.memory_space<vmem>>) attributes {dimension_semantics = [#tpu.dimension_semantics<parallel>, #tpu.dimension_semantics<parallel>, #tpu.dimension_semantics<arbitrary>], iteration_bounds = array<i64: 1, 1, 1>, scalar_prefetch = 0 : i64, scratch_operands = 2 : i64, tpu.core_type = #tpu.core_type<tc>, window_params = [{transform_indices = @transform_0, window_bounds = array<i64: 16, 32>}, {transform_indices = @transform_1, window_bounds = array<i64: 32, 32>}, {transform_indices = @transform_2, window_bounds = array<i64: 1, 32>}, {transform_indices = @transform_3, window_bounds = array<i64: 32, 8>}, {transform_indices = @transform_4, window_bounds = array<i64: 8, 32>}, {transform_indices = @transform_5, window_bounds = array<i64: 16, 32>}]} {
    %c0_i32 = arith.constant 0 : i32
    %0 = arith.cmpi eq, %arg2, %c0_i32 : i32
    %1 = arith.extui %0 : i1 to i32
    %c0_i32_0 = arith.constant 0 : i32
    %2 = arith.cmpi ne, %1, %c0_i32_0 : i32
    scf.if %2 {
      %cst_17 = arith.constant 0.000000e+00 : f32
      %17 = vector.broadcast %cst_17 : f32 to vector<16x32xf32>
      %c0_18 = arith.constant 0 : index
      %c0_19 = arith.constant 0 : index
      %18 = vector.load %arg9[%c0_18, %c0_19] : memref<16x32xf32, #tpu.memory_space<vmem>>, vector<16x32xf32>
      tpu.vector_store %arg9[%c0_18, %c0_19], %17 {strides = array<i32>} : memref<16x32xf32, #tpu.memory_space<vmem>>, vector<16x32xf32>,
      %cst_20 = arith.constant 0.000000e+00 : f32
      %19 = vector.broadcast %cst_20 : f32 to vector<16x8xf32>
      %c0_21 = arith.constant 0 : index
      %c0_22 = arith.constant 0 : index
      %20 = vector.load %arg10[%c0_21, %c0_22] : memref<16x8xf32, #tpu.memory_space<vmem>>, vector<16x8xf32>
      tpu.vector_store %arg10[%c0_21, %c0_22], %19 {strides = array<i32>} : memref<16x8xf32, #tpu.memory_space<vmem>>, vector<16x8xf32>,
    } else {
    }
    %c0 = arith.constant 0 : index
    %c0_1 = arith.constant 0 : index
    %3 = vector.load %arg3[%c0, %c0_1] : memref<16x32xf32, #tpu.memory_space<vmem>>, vector<16x32xf32>
    %c0_2 = arith.constant 0 : index
    %c0_3 = arith.constant 0 : index
    %4 = vector.load %arg9[%c0_2, %c0_3] : memref<16x32xf32, #tpu.memory_space<vmem>>, vector<16x32xf32>
    %c0_4 = arith.constant 0 : index
    %c0_5 = arith.constant 0 : index
    %5 = vector.load %arg4[%c0_4, %c0_5] : memref<32x32xf32, #tpu.memory_space<vmem>>, vector<32x32xf32>
    %cst = arith.constant dense<0.000000e+00> : vector<16x32xf32>
    %6 = tpu.matmul %3, %5, %cst {dimension_numbers = #tpu.dot_dimension_numbers<[1], [1], [0], [0], [0, 0, 1, 0], [], []>} : vector<16x32xf32>, vector<32x32xf32>, vector<16x32xf32> -> vector<16x32xf32>
    %7 = arith.addf %4, %6 : vector<16x32xf32>
    %c0_6 = arith.constant 0 : index
    %c0_7 = arith.constant 0 : index
    %8 = vector.load %arg9[%c0_6, %c0_7] : memref<16x32xf32, #tpu.memory_space<vmem>>, vector<16x32xf32>
    tpu.vector_store %arg9[%c0_6, %c0_7], %7 {strides = array<i32>} : memref<16x32xf32, #tpu.memory_space<vmem>>, vector<16x32xf32>,
    %c0_8 = arith.constant 0 : index
    %c0_9 = arith.constant 0 : index
    %9 = vector.load %arg10[%c0_8, %c0_9] : memref<16x8xf32, #tpu.memory_space<vmem>>, vector<16x8xf32>
    %c0_10 = arith.constant 0 : index
    %c0_11 = arith.constant 0 : index
    %10 = vector.load %arg6[%c0_10, %c0_11] : memref<32x8xf32, #tpu.memory_space<vmem>>, vector<32x8xf32>
    %cst_12 = arith.constant dense<0.000000e+00> : vector<16x8xf32>
    %11 = tpu.matmul %3, %10, %cst_12 {dimension_numbers = #tpu.dot_dimension_numbers<[1], [0], [0], [1], [0, 0, 1, 1], [], []>} : vector<16x32xf32>, vector<32x8xf32>, vector<16x8xf32> -> vector<16x8xf32>
    %12 = arith.addf %9, %11 : vector<16x8xf32>
    %c0_13 = arith.constant 0 : index
    %c0_14 = arith.constant 0 : index
    %13 = vector.load %arg10[%c0_13, %c0_14] : memref<16x8xf32, #tpu.memory_space<vmem>>, vector<16x8xf32>
    tpu.vector_store %arg10[%c0_13, %c0_14], %12 {strides = array<i32>} : memref<16x8xf32, #tpu.memory_space<vmem>>, vector<16x8xf32>,
    %c0_i32_15 = arith.constant 0 : i32
    %14 = arith.cmpi eq, %arg2, %c0_i32_15 : i32
    %15 = arith.extui %14 : i1 to i32
    %c0_i32_16 = arith.constant 0 : i32
    %16 = arith.cmpi ne, %15, %c0_i32_16 : i32
    scf.if %16 {
      %c0_17 = arith.constant 0 : index
      %c0_18 = arith.constant 0 : index
      %17 = vector.load %arg10[%c0_17, %c0_18] : memref<16x8xf32, #tpu.memory_space<vmem>>, vector<16x8xf32>
      %cst_19 = arith.constant 4.000000e+00 : f32
      %18 = vector.broadcast %cst_19 : f32 to vector<16x8xf32>
      %19 = arith.mulf %18, %17 : vector<16x8xf32>
      %c0_20 = arith.constant 0 : index
      %c0_21 = arith.constant 0 : index
      %20 = vector.load %arg7[%c0_20, %c0_21] : memref<8x32xf32, #tpu.memory_space<vmem>>, vector<8x32xf32>
      %cst_22 = arith.constant dense<0.000000e+00> : vector<16x32xf32>
      %21 = tpu.matmul %19, %20, %cst_22 {dimension_numbers = #tpu.dot_dimension_numbers<[1], [0], [0], [1], [0, 0, 1, 1], [], []>} : vector<16x8xf32>, vector<8x32xf32>, vector<16x32xf32> -> vector<16x32xf32>
      %c0_23 = arith.constant 0 : index
      %c0_24 = arith.constant 0 : index
      %22 = vector.load %arg9[%c0_23, %c0_24] : memref<16x32xf32, #tpu.memory_space<vmem>>, vector<16x32xf32>
      %c0_25 = arith.constant 0 : index
      %c0_26 = arith.constant 0 : index
      %23 = vector.load %arg5[%c0_25, %c0_26] : memref<1x32xf32, #tpu.memory_space<vmem>>, vector<1x32xf32>
      %24 = vector.broadcast %23 : vector<1x32xf32> to vector<16x32xf32>
      %25 = arith.addf %22, %24 : vector<16x32xf32>
      %26 = arith.addf %25, %21 : vector<16x32xf32>
      %c0_27 = arith.constant 0 : index
      %c0_28 = arith.constant 0 : index
      %27 = vector.load %arg8[%c0_27, %c0_28] : memref<16x32xf32, #tpu.memory_space<vmem>>, vector<16x32xf32>
      tpu.vector_store %arg8[%c0_27, %c0_28], %26 {strides = array<i32>} : memref<16x32xf32, #tpu.memory_space<vmem>>, vector<16x32xf32>,
    } else {
    }
    return
  }
  func.func @transform_0(%arg0: i32, %arg1: i32, %arg2: i32) -> (i32, i32) {
    %c0_i32 = arith.constant 0 : i32
    return %arg0, %arg2 : i32, i32
  }
  func.func @transform_1(%arg0: i32, %arg1: i32, %arg2: i32) -> (i32, i32) {
    %c0_i32 = arith.constant 0 : i32
    return %arg1, %arg2 : i32, i32
  }
  func.func @transform_2(%arg0: i32, %arg1: i32, %arg2: i32) -> (i32, i32) {
    %c0_i32 = arith.constant 0 : i32
    %c0_i32_0 = arith.constant 0 : i32
    return %c0_i32, %arg1 : i32, i32
  }
  func.func @transform_3(%arg0: i32, %arg1: i32, %arg2: i32) -> (i32, i32) {
    %c0_i32 = arith.constant 0 : i32
    %c0_i32_0 = arith.constant 0 : i32
    return %arg2, %c0_i32 : i32, i32
  }
  func.func @transform_4(%arg0: i32, %arg1: i32, %arg2: i32) -> (i32, i32) {
    %c0_i32 = arith.constant 0 : i32
    %c0_i32_0 = arith.constant 0 : i32
    return %c0_i32, %arg1 : i32, i32
  }
  func.func @transform_5(%arg0: i32, %arg1: i32, %arg2: i32) -> (i32, i32) {
    %c0_i32 = arith.constant 0 : i32
    return %arg0, %arg1 : i32, i32
  }
}

</mosaic_0001>

<bundles_post_ra>
// kernel: tpu_custom_call.1
= control target key start
LH: loop header
LB: loop body
LE: loop exit
PB: predicated region body
PF: predicated region fallthrough
CT: control target
= control target key end

     0   :  { %10 = vsyncpa [#allocation5], 0  ;;  %s561_s0 = inlined_call_operand.hbm [shape: f32[16,32], index: 0, kind: input, shape index: {}]   ;;  %s562_s1 = inlined_call_operand.vmem [shape: f32[32,32], index: 1, kind: input, shape index: {}]   ;;  %s563_s2 = inlined_call_operand.vmem [shape: f32[1,32], index: 2, kind: input, shape index: {}]   ;;  %s564_s3 = inlined_call_operand.vmem [shape: f32[32,8], index: 3, kind: input, shape index: {}]   ;;  %s565_s4 = inlined_call_operand.vmem [shape: f32[8,32], index: 4, kind: input, shape index: {}]   ;;  %s566_s5 = inlined_call_operand.hbm [shape: f32[16,32], index: 5, kind: output, shape index: {}]  }
   0x1   :  { %11 = vsyncpa [#allocation6], 0  ;;  %s460_s18 = smov [#allocation4]  }
   0x2   :  { %s17_s19 = sshll.u32 %s460_s18, 4  ;;  %s18_s19 = int_to_ptr.vmem [resolvable:$true] %s17_s19 }
   0x3   :  { %s424_s20 = scalar_lea.vmem %s18_s19, 256  ;;  %p429_p1 = scmp.lt.s32.totalorder %s18_s19, %s18_s19 }
   0x4   :  { %p425_p0 = scmp.ne.s32.totalorder %s18_s19, %s424_s20  ;;  %p430_p2 = scmp.lt.s32.totalorder %s424_s20, %s424_s20 }
   0x6   :  { %p431_p3 = por %p430_p2, %p429_p1 }
   0x8   :  { %p432_p4 = pnand %p431_p3, %p425_p0 }
   0xa   :  { %435 = shalt.err (!%p432_p4)
}
   0xb   :  { %s461_s21 = smov 128   ;;  %s462_s22 = smov 8  }
   0xc   :  { %23 = dma.hbm_to_vmem [thread:$0]  %s561_s0, 256, %s18_s19, [#allocation5], %s461_s21, %s461_s21, %s462_s22  }
   0xd   :  { %456 = dma.done.wait [#allocation5], 256  }
   0xe   :  { %457 = vsyncadd [#allocation5], 4294967040  ;;  %vm39_vm0 = vcmask 261120   ;;  %vm42_vm1 = vcmask 64512   ;;  %v463_v0 = vmov 0.0   ;;  %v156_v1 = vld [vmem:[%s564_s3 + $0x18] sm:$0xff] }
   0xf   :  { %44 = vst.msk [vmem:[#allocation3 + $0x8] sm:$0xff] %vm42_vm1, %v463_v0  ;;  %43 = vst.msk [vmem:[#allocation3] sm:$0xff] %vm42_vm1, %v463_v0  ;;  %v155_v2 = vld [vmem:[%s564_s3 + $0x10] sm:$0xff]  ;;  %395 = vmatprep.subr.mxu1 %v156_v1  ;;  %v45_v3 = vld [vmem:[#allocation4] sm:$0xff]  ;;  %s464_s16 = smov [#allocation7]  }
  0x10   :  { %40 = vst.msk [vmem:[#allocation2] sm:$0xff] %vm39_vm0, %v463_v0  ;;  %41 = vst.msk [vmem:[#allocation2 + $0x8] sm:$0xff] %vm39_vm0, %v463_v0  ;;  %396 = vmatpush3.msra.mxu1 %v156_v1  ;;  %v154_v4 = vld [vmem:[%s564_s3 + $0x8] sm:$0xff]  ;;  %403 = vmatprep.mubr.msk.f32.mxu1 %vm39_vm0, %v45_v3  ;;  %v52_v5 = vld [vmem:[%s562_s1 + $0x18] sm:$0xff]  ;;  %s346_s17 = sshll.u32 %s464_s16, 4  ;;  %s347_s17 = int_to_ptr.vmem [resolvable:$true] %s346_s17 }
  0x11   :  { %v51_v6 = vld [vmem:[%s562_s1 + $0x10] sm:$0xff]  ;;  %397 = vmatprep.subr.mxu1 %v155_v2  ;;  %384 = vmatprep.subr.msk.mxu0 %vm39_vm0, %v52_v5  ;;  %v153_v7 = vld [vmem:[%s564_s3] sm:$0xff]  ;;  %v46_v8 = vld [vmem:[#allocation4 + $0x8] sm:$0xff]  ;;  %s436_s18 = scalar_lea.vmem %s347_s17, 256  ;;  %p441_p6 = scmp.lt.s32.totalorder %s347_s17, %s347_s17 }
  0x12   :  { %398 = vmatpush3.msra.mxu1 %v155_v2  ;;  %385 = vmatpush3.xpose.msk.msra.mxu0 %vm39_vm0, %v52_v5  ;;  %v50_v9 = vld [vmem:[%s562_s1 + $0x8] sm:$0xff]  ;;  %v49_v10 = vld [vmem:[%s562_s1] sm:$0xff]  ;;  %p437_p5 = scmp.ne.s32.totalorder %s347_s17, %s436_s18  ;;  %p442_p7 = scmp.lt.s32.totalorder %s436_s18, %s436_s18 }
  0x13   :  { %399 = vmatprep.subr.mxu1 %v154_v4  ;;  %386 = vmatprep.subr.msk.mxu0 %vm39_vm0, %v51_v6  ;;  %v244_v11 = vld [vmem:[%s565_s4] sm:$0xff] }
  0x14   :  { %400 = vmatpush3.msra.mxu1 %v154_v4  ;;  %392 = vmatprep.mubr.msk.f32.mxu0 %vm39_vm0, %v45_v3  ;;  %v368_v29 = vld [vmem:[%s563_s2] ss:$0 sm:$0xff]  ;;  %p443_p8 = por %p442_p7, %p441_p6 }
  0x15   :  { %401 = vmatprep.subr.mxu1 %v153_v7 }
  0x16   :  { %402 = vmatpush3.msra.mxu1 %v153_v7  ;;  %387 = vmatpush3.xpose.msk.msra.mxu0 %vm39_vm0, %v51_v6  ;;  %v152_v12 = vld [vmem:[#allocation3 + $0x8] sm:$0xff]  ;;  %v151_v14 = vld [vmem:[#allocation3] sm:$0xff]  ;;  %p444_p9 = pnand %p443_p8, %p437_p5 }
  0x17   :  { %404 = vmatmul.mubr.msk.f32.vlgmr.msra.gmra.mxu1 %vm39_vm0, %v46_v8  ;;  %388 = vmatprep.subr.msk.mxu0 %vm39_vm0, %v50_v9  ;;  %v48_v18 = vld [vmem:[#allocation2 + $0x8] sm:$0xff]  ;;  %v47_v20 = vld [vmem:[#allocation2] sm:$0xff] }
  0x18   :  { %406 = vmatprep.subr.mxu1 %v244_v11 }
  0x19   :  { %407 = vmatpush3.msra.mxu1 %v244_v11 }
  0x1a   :  { %389 = vmatpush3.xpose.msk.msra.mxu0 %vm39_vm0, %v50_v9 }
  0x1b   :  { %390 = vmatprep.subr.msk.mxu0 %vm39_vm0, %v49_v10 }
  0x1e   :  { %391 = vmatpush3.xpose.msk.msra.mxu0 %vm39_vm0, %v49_v10 }
  0x21   :  { %393 = vmatmul.mubr.msk.f32.vlgmr.msra.gmra.mxu0 %vm39_vm0, %v46_v8 }
  0xd7   :  { %v405_v13 = vpop.f32.mrf.mxu1 }
  0xd8   :  { %v233_v15 = vadd.f32 %v405_v13, %v152_v12 }
  0xd9   :  { %v223_v16 = vpop.f32.mrf.mxu1 }
  0xda   :  { %236 = vst.msk [vmem:[#allocation3 + $0x8] sm:$0xff] %vm42_vm1, %v233_v15  ;;  %v232_v17 = vadd.f32 %v223_v16, %v151_v14 }
  0xdc   :  { %235 = vst.msk [vmem:[#allocation3] sm:$0xff] %vm42_vm1, %v232_v17 }
  0xe1   :  { %v394_v19 = vpop.f32.mrf.mxu0  ;;  %v241_v21 = vld [vmem:[#allocation3 + $0x8] sm:$0xff] }
  0xe2   :  { %v148_v22 = vadd.f32 %v394_v19, %v48_v18  ;;  %v243_v27 = vmul.f32 4.0, %v241_v21 }
  0xe3   :  { %v240_v23 = vld [vmem:[#allocation3] sm:$0xff]  ;;  %v138_v24 = vpop.f32.mrf.mxu0 }
  0xe4   :  { %v242_v25 = vmul.f32 4.0, %v240_v23  ;;  %150 = vst.msk [vmem:[#allocation2 + $0x8] sm:$0xff] %vm39_vm0, %v148_v22  ;;  %v147_v26 = vadd.f32 %v138_v24, %v47_v20 }
  0xe6   :  { %408 = vmatprep.mubr.msk.f32.mxu1 %vm42_vm1, %v242_v25  ;;  %149 = vst.msk [vmem:[#allocation2] sm:$0xff] %vm39_vm0, %v147_v26 }
  0xe7   :  { %409 = vmatmul.mubr.msk.f32.vlgmr.msra.gmra.mxu1 %vm42_vm1, %v243_v27 }
  0xeb   :  { %v327_v28 = vld [vmem:[#allocation2 + $0x8] sm:$0xff] }
  0xec   :  { %v336_v30 = vadd.f32 %v368_v29, %v327_v28 }
  0xed   :  { %v326_v31 = vld [vmem:[#allocation2] sm:$0xff] }
  0xee   :  { %v335_v34 = vadd.f32 %v368_v29, %v326_v31 }
 0x1a7   :  { %v410_v32 = vpop.f32.mrf.mxu1 }
 0x1a8   :  { %v338_v33 = vadd.f32 %v410_v32, %v336_v30 }
 0x1a9   :  { %v317_v35 = vpop.f32.mrf.mxu1 }
 0x1aa   :  { %340 = vst.msk [vmem:[#allocation7 + $0x8] sm:$0xff] %vm39_vm0, %v338_v33  ;;  %v337_v36 = vadd.f32 %v335_v34, %v317_v35 }
 0x1ac   :  { %339 = vst.msk [vmem:[#allocation7] sm:$0xff] %vm39_vm0, %v337_v36 }
 0x1ad   :  { %447 = shalt.err (!%p444_p9)
}
 0x1ae   :  { %352 = dma.vmem_to_hbm [thread:$0]  %s347_s17, 256, %s566_s5, [#allocation6], %s461_s21, %s461_s21, %s462_s22  }
 0x1af   :  { %458 = dma.done.wait [#allocation6], 256  }
 0x1b0   :  { %459 = vsyncadd [#allocation6], 4294967040 }
 0x1b1   :  { %356 = vsyncpa [#allocation5], 1 }
 0x1b2   :  { %357 = vsyncpa [#allocation6], 1 }

</bundles_post_ra>
